<compile_context>
chip_gen: v7x
topology: tpu7x:2x2x1
jax: 0.10.0
libtpu: 0.0.40
codegen_flags: <defaults>
</compile_context>

<pallas_src>
import functools

import jax
import jax.numpy as jnp
from jax.experimental import pallas as pl
from jax.experimental.pallas import tpu as pltpu


_BLOCK_BUDGET_BYTES = 8 * 1024 * 1024  # per x block (Pallas double-buffers it)


def _largest_divisor(n, cap, step):
    """Largest d <= cap with n % d == 0 and d % step == 0; fall back to n."""
    if n <= cap:
        return n
    d = (cap // step) * step
    while d >= step:
        if n % d == 0:
            return d
        d -= step
    return n


def _choose_tiles(B, HW, C, itemsize, budget=_BLOCK_BUDGET_BYTES):
    """Pick (batch_tile, hw_tile) so one x block stays under `budget` bytes."""
    row_bytes = HW * C * itemsize  # one batch element, full spatial extent
    if B * row_bytes <= budget:
        return B, HW
    if row_bytes * 8 <= budget:
        # Keep full HW per step; tile the batch (multiple of 8 for the output
        # block's sublane constraint).
        tb = _largest_divisor(B, budget // row_bytes, 8)
        return tb, HW
    # Tile both: minimal valid batch tile, then chunk HW.
    tb = 8 if B % 8 == 0 else B
    step_bytes = tb * C * itemsize  # bytes per single HW position
    cap_hw = max(8, budget // step_bytes)
    thw = _largest_divisor(HW, cap_hw, 8)
    return tb, thw


def _anyhead_kernel(x_ref, w_ref, b_ref, o_ref, acc_ref, *, inv_hw):
    # x_ref: (tb, thw, C)   w_ref: (C, NCp)   b_ref: (1, NCp)
    # o_ref: (tb, NCp)      acc_ref: (tb, C) f32 scratch (pooled sum)
    s = pl.program_id(1)

    @pl.when(s == 0)
    def _init():
        acc_ref[...] = jnp.zeros_like(acc_ref)

    # Accumulate the spatial sum for this HW chunk with an f32 accumulator
    # (no full-block upcast copy of x).
    acc_ref[...] += jnp.sum(x_ref[...], axis=1, dtype=jnp.float32)

    @pl.when(s == pl.num_programs(1) - 1)
    def _finalize():
        pooled = acc_ref[...] * inv_hw                     # (tb, C), f32
        w = w_ref[...].astype(jnp.float32)                 # (C, NCp)
        b = b_ref[...].astype(jnp.float32)                 # (1, NCp)
        out = jnp.dot(pooled, w, preferred_element_type=jnp.float32) + b
        o_ref[...] = out.astype(o_ref.dtype)


def anyhead_forward(x_nchw, weight, bias, *, batch_tile=None, hw_tile=None):
    """x_nchw: (B, C, H, W); weight: (nc, C) [PyTorch Linear layout]; bias: (nc,)."""
    B, C, H, W = x_nchw.shape
    nc = weight.shape[0]
    HW = H * W

    # NHWC-flattened layout: C on lanes, HW on sublanes (lane-dense DMA tiles).
    x_bhwc = jnp.transpose(x_nchw, (0, 2, 3, 1)).reshape(B, HW, C)
    w_t = weight.T                    # (C, nc)
    b_2d = bias.reshape(1, nc)

    # Pad nc to a lane-dense multiple of 128 only when it is large & awkward
    # (e.g. 1000); for tiny nc the masked store is irrelevant.
    nc_pad = nc
    if nc > 128 and nc % 128 != 0:
        nc_pad = ((nc + 127) // 128) * 128
        w_t = jnp.pad(w_t, ((0, 0), (0, nc_pad - nc)))
        b_2d = jnp.pad(b_2d, ((0, 0), (0, nc_pad - nc)))

    itemsize = jnp.dtype(x_nchw.dtype).itemsize
    tb_auto, thw_auto = _choose_tiles(B, HW, C, itemsize)
    tb = batch_tile if batch_tile is not None else tb_auto
    thw = hw_tile if hw_tile is not None else thw_auto

    grid = (B // tb, HW // thw)       # batch: parallel, HW chunks: reduction
    inv_hw = 1.0 / float(HW)

    out = pl.pallas_call(
        functools.partial(_anyhead_kernel, inv_hw=inv_hw),
        out_shape=jax.ShapeDtypeStruct((B, nc_pad), x_nchw.dtype),
        grid_spec=pltpu.PrefetchScalarGridSpec(
            num_scalar_prefetch=0,
            grid=grid,
            in_specs=[
                pl.BlockSpec((tb, thw, C), lambda bi, si: (bi, si, 0)),
                pl.BlockSpec((C, nc_pad), lambda bi, si: (0, 0)),   # VMEM-resident
                pl.BlockSpec((1, nc_pad), lambda bi, si: (0, 0)),   # VMEM-resident
            ],
            out_specs=pl.BlockSpec((tb, nc_pad), lambda bi, si: (bi, 0)),
            scratch_shapes=[pltpu.VMEM((tb, C), jnp.float32)],
        ),
        compiler_params=pltpu.CompilerParams(
            dimension_semantics=("parallel", "arbitrary"),
            vmem_limit_bytes=48 * 1024 * 1024,
        ),
    )(x_bhwc, w_t, b_2d)

    if nc_pad != nc:
        out = out[:, :nc]
    return out


if __name__ == "__main__":
    key = jax.random.PRNGKey(0)
    k_x, k_w, k_b = jax.random.split(key, 3)

    # Small shapes consistent with the module: B=2, C(w_in)=4, H=W=16, nc=8.
    B, C, H, W, NC = 2, 4, 16, 16, 8

    x = jax.random.normal(k_x, (B, C, H, W), dtype=jnp.float32)
    # PyTorch Linear layout: (nc, w_in).
    weight = jax.random.normal(k_w, (NC, C), dtype=jnp.float32) * 0.1
    bias = jax.random.normal(k_b, (NC,), dtype=jnp.float32) * 0.1

    # Force a 4-step HW reduction (chunks of 64) so the init/accumulate/finalize
    # path is exercised even at this small size.
    out = anyhead_forward(x, weight, bias, hw_tile=64)
    out = jax.block_until_ready(out)

    # Reference check in plain JAX (same math as the PyTorch forward).
    pooled_ref = jnp.mean(x, axis=(2, 3))          # (B, C)
    out_ref = pooled_ref @ weight.T + bias         # (B, NC)
    assert out.shape == (B, NC)
    assert jnp.allclose(out, out_ref, atol=1e-5, rtol=1e-5)

    print("KERNEL_OK")
</pallas_src>

<mosaic_0001>
module attributes {stable_mosaic.version = 11 : i64} {
  func.func @_anyhead_kernel(%arg0: i32, %arg1: i32, %arg2: memref<2x64x4xf32, #tpu.memory_space<vmem>>, %arg3: memref<4x8xf32, #tpu.memory_space<vmem>>, %arg4: memref<1x8xf32, #tpu.memory_space<vmem>>, %arg5: memref<2x8xf32, #tpu.memory_space<vmem>>, %arg6: memref<2x4xf32, #tpu.memory_space<vmem>>) attributes {dimension_semantics = [#tpu.dimension_semantics<parallel>, #tpu.dimension_semantics<arbitrary>], iteration_bounds = array<i64: 1, 4>, scalar_prefetch = 0 : i64, scratch_operands = 1 : i64, tpu.core_type = #tpu.core_type<tc>, window_params = [{transform_indices = @transform_0, window_bounds = array<i64: 2, 64, 4>}, {pipeline_mode = #tpu.pipeline_mode<synchronous>, transform_indices = @transform_1, window_bounds = array<i64: 4, 8>}, {pipeline_mode = #tpu.pipeline_mode<synchronous>, transform_indices = @transform_2, window_bounds = array<i64: 1, 8>}, {transform_indices = @transform_3, window_bounds = array<i64: 2, 8>}]} {
    %c0_i32 = arith.constant 0 : i32
    %0 = arith.cmpi eq, %arg1, %c0_i32 : i32
    %1 = arith.extui %0 : i1 to i32
    %c0_i32_0 = arith.constant 0 : i32
    %2 = arith.cmpi ne, %1, %c0_i32_0 : i32
    scf.if %2 {
      %cst_8 = arith.constant 0.000000e+00 : f32
      %11 = vector.broadcast %cst_8 : f32 to vector<2x4xf32>
      %c0_9 = arith.constant 0 : index
      %c0_10 = arith.constant 0 : index
      %12 = vector.load %arg6[%c0_9, %c0_10] : memref<2x4xf32, #tpu.memory_space<vmem>>, vector<2x4xf32>
      tpu.vector_store %arg6[%c0_9, %c0_10], %11 {strides = array<i32>} : memref<2x4xf32, #tpu.memory_space<vmem>>, vector<2x4xf32>,
    } else {
    }
    %c0 = arith.constant 0 : index
    %c0_1 = arith.constant 0 : index
    %3 = vector.load %arg6[%c0, %c0_1] : memref<2x4xf32, #tpu.memory_space<vmem>>, vector<2x4xf32>
    %c0_2 = arith.constant 0 : index
    %c0_3 = arith.constant 0 : index
    %c0_4 = arith.constant 0 : index
    %4 = vector.load %arg2[%c0_2, %c0_3, %c0_4] : memref<2x64x4xf32, #tpu.memory_space<vmem>>, vector<2x64x4xf32>
    %cst = arith.constant dense<0.000000e+00> : vector<2x4xf32>
    %5 = vector.multi_reduction <add>, %4, %cst [1] : vector<2x64x4xf32> to vector<2x4xf32>
    %6 = arith.addf %3, %5 : vector<2x4xf32>
    %c0_5 = arith.constant 0 : index
    %c0_6 = arith.constant 0 : index
    %7 = vector.load %arg6[%c0_5, %c0_6] : memref<2x4xf32, #tpu.memory_space<vmem>>, vector<2x4xf32>
    tpu.vector_store %arg6[%c0_5, %c0_6], %6 {strides = array<i32>} : memref<2x4xf32, #tpu.memory_space<vmem>>, vector<2x4xf32>,
    %c3_i32 = arith.constant 3 : i32
    %8 = arith.cmpi eq, %arg1, %c3_i32 : i32
    %9 = arith.extui %8 : i1 to i32
    %c0_i32_7 = arith.constant 0 : i32
    %10 = arith.cmpi ne, %9, %c0_i32_7 : i32
    scf.if %10 {
      %c0_8 = arith.constant 0 : index
      %c0_9 = arith.constant 0 : index
      %11 = vector.load %arg6[%c0_8, %c0_9] : memref<2x4xf32, #tpu.memory_space<vmem>>, vector<2x4xf32>
      %cst_10 = arith.constant 3.906250e-03 : f32
      %12 = vector.broadcast %cst_10 : f32 to vector<2x4xf32>
      %13 = arith.mulf %11, %12 : vector<2x4xf32>
      %c0_11 = arith.constant 0 : index
      %c0_12 = arith.constant 0 : index
      %14 = vector.load %arg3[%c0_11, %c0_12] : memref<4x8xf32, #tpu.memory_space<vmem>>, vector<4x8xf32>
      %c0_13 = arith.constant 0 : index
      %c0_14 = arith.constant 0 : index
      %15 = vector.load %arg4[%c0_13, %c0_14] : memref<1x8xf32, #tpu.memory_space<vmem>>, vector<1x8xf32>
      %cst_15 = arith.constant dense<0.000000e+00> : vector<2x8xf32>
      %16 = tpu.matmul %13, %14, %cst_15 {dimension_numbers = #tpu.dot_dimension_numbers<[1], [0], [0], [1], [0, 0, 1, 1], [], []>} : vector<2x4xf32>, vector<4x8xf32>, vector<2x8xf32> -> vector<2x8xf32>
      %17 = vector.broadcast %15 : vector<1x8xf32> to vector<2x8xf32>
      %18 = arith.addf %16, %17 : vector<2x8xf32>
      %c0_16 = arith.constant 0 : index
      %c0_17 = arith.constant 0 : index
      %19 = vector.load %arg5[%c0_16, %c0_17] : memref<2x8xf32, #tpu.memory_space<vmem>>, vector<2x8xf32>
      tpu.vector_store %arg5[%c0_16, %c0_17], %18 {strides = array<i32>} : memref<2x8xf32, #tpu.memory_space<vmem>>, vector<2x8xf32>,
    } else {
    }
    return
  }
  func.func @transform_0(%arg0: i32, %arg1: i32) -> (i32, i32, i32) {
    %c0_i32 = arith.constant 0 : i32
    %c0_i32_0 = arith.constant 0 : i32
    return %arg0, %arg1, %c0_i32 : i32, i32, i32
  }
  func.func @transform_1(%arg0: i32, %arg1: i32) -> (i32, i32) {
    %c0_i32 = arith.constant 0 : i32
    %c0_i32_0 = arith.constant 0 : i32
    %c0_i32_1 = arith.constant 0 : i32
    return %c0_i32, %c0_i32_0 : i32, i32
  }
  func.func @transform_2(%arg0: i32, %arg1: i32) -> (i32, i32) {
    %c0_i32 = arith.constant 0 : i32
    %c0_i32_0 = arith.constant 0 : i32
    %c0_i32_1 = arith.constant 0 : i32
    return %c0_i32, %c0_i32_0 : i32, i32
  }
  func.func @transform_3(%arg0: i32, %arg1: i32) -> (i32, i32) {
    %c0_i32 = arith.constant 0 : i32
    %c0_i32_0 = arith.constant 0 : i32
    return %arg0, %c0_i32 : i32, i32
  }
}

</mosaic_0001>

<bundles_post_ra>
// kernel: tpu_custom_call.1
= control target key start
LH: loop header
LB: loop body
LE: loop exit
PB: predicated region body
PF: predicated region fallthrough
CT: control target
= control target key end

     0   :  { %8 = vsyncpa [#allocation5], 0  ;;  %s680_s12 = smov 0   ;;  %s682_s13 = smov 0   ;;  %s831_s0 = inlined_call_operand.vmem [shape: f32[2,256,4], index: 0, kind: input, shape index: {}]   ;;  %s832_s1 = inlined_call_operand.vmem [shape: f32[4,8], index: 1, kind: input, shape index: {}]   ;;  %s833_s2 = inlined_call_operand.vmem [shape: f32[1,8], index: 2, kind: input, shape index: {}]   ;;  %s834_s3 = inlined_call_operand.hbm [shape: f32[2,8], index: 3, kind: output, shape index: {}]  }
   0x1   :  { %s684_s14 = smov 0   ;;  %s686_s15 = smov 0  }
   0x2   :  { %s688_s16 = smov 0  }
   0x3 LB: > { %s511_s17 = sadd.s32 4294967295, %s654_s16   ;;  %s23_s18 = sadd.s32 1, %s650_s15  ;;  %s654_s16 = sphi %s688_s16, %s14_s16   ;;  %s650_s15 = sphi %s686_s15, %s839_s15   ;;  %s646_s14 = sphi %s684_s14, %s838_s14   ;;  %s642_s13 = sphi %s682_s13, %s837_s13   ;;  %s638_s12 = sphi %s680_s12, %s836_s12  }
   0x4   : > { %p24_p0 = scmp.ge.s32.totalorder %s23_s18, 4  ;;  %p42_p1 = scmp.ne.s32.totalorder %s642_s13, %s638_s12 }
   0x5   : > { %p43_p2 = scmp.eq.s32.totalorder %s654_s16, 0  ;;  %s35_s20 = sadd.s32 1, %s642_s13 }
   0x6   : > { %s841_s18 = smov (%p24_p0, %s23_s18), 0  ;;  %p513_p5 = scmp.ge.s32.totalorder %s654_s16, 4 }
   0x7   : > { %p44_p3 = por %p43_p2, %p42_p1  ;;  %s31_s19 = ssub.s32 %s650_s15, %s841_s18 }
   0x8   : > { %p33_p4 = scmp.eq.s32.totalorder %s31_s19, 0  ;;  %142 = sbr.rel (%p513_p5) target bundleno = 27 (0x1b), region = 24 }
   0xa   : > { %s716_s21 = scalar_select %p33_p4, %s642_s13, %s35_s20  }
   0xf   : > { %145 = sbr.rel (!%p44_p3) target bundleno = 27 (0x1b), region = 28  ;;  %s147_s22 = sand.u32 (%p44_p3), 1, %s642_s13  }
  0x10   : > { %s528_s23 = sshll.u32 (%p44_p3), %s650_s15, 6  ;;  %s514_s24 = sshll.u32 (%p44_p3), %s147_s22, 7 }
  0x11   : > { %s724_s27 = scalar_lea.vmem (%p44_p3), %s831_s0, %s528_s23  ;;  %s149_s28 = scalar_lea.vmem (%p44_p3), [#allocation3], %s514_s24 }
  0x12   : > { %v213_v0 = vld [vmem:[%s724_s27] sm:$0xff] (%p44_p3)  ;;  %v215_v1 = vld [vmem:[%s724_s27 + $0x8] sm:$0xff] (%p44_p3)  ;;  %v217_v2 = vld [vmem:[%s724_s27 + $0x10] sm:$0xff] (%p44_p3) }
  0x13   : > { %214 = vst [vmem:[%s149_s28] sm:$0xff] (%p44_p3), %v213_v0  ;;  %216 = vst [vmem:[%s149_s28 + $0x8] sm:$0xff] (%p44_p3), %v215_v1  ;;  %v219_v3 = vld [vmem:[%s724_s27 + $0x18] sm:$0xff] (%p44_p3)  ;;  %v221_v4 = vld [vmem:[%s724_s27 + $0x20] sm:$0xff] (%p44_p3) }
  0x14   : > { %218 = vst [vmem:[%s149_s28 + $0x10] sm:$0xff] (%p44_p3), %v217_v2  ;;  %v223_v5 = vld [vmem:[%s724_s27 + $0x28] sm:$0xff] (%p44_p3)  ;;  %220 = vst [vmem:[%s149_s28 + $0x18] sm:$0xff] (%p44_p3), %v219_v3  ;;  %v225_v6 = vld [vmem:[%s724_s27 + $0x30] sm:$0xff] (%p44_p3) }
  0x15   : > { %222 = vst [vmem:[%s149_s28 + $0x20] sm:$0xff] (%p44_p3), %v221_v4  ;;  %224 = vst [vmem:[%s149_s28 + $0x28] sm:$0xff] (%p44_p3), %v223_v5  ;;  %v227_v7 = vld [vmem:[%s724_s27 + $0x38] sm:$0xff] (%p44_p3)  ;;  %v229_v8 = vld [vmem:[%s724_s27 + $0x100] sm:$0xff] (%p44_p3) }
  0x16   : > { %226 = vst [vmem:[%s149_s28 + $0x30] sm:$0xff] %v225_v6  ;;  %228 = vst [vmem:[%s149_s28 + $0x38] sm:$0xff] %v227_v7  ;;  %v231_v9 = vld [vmem:[%s724_s27 + $0x108] sm:$0xff]  ;;  %v233_v10 = vld [vmem:[%s724_s27 + $0x110] sm:$0xff] }
  0x17   : > { %230 = vst [vmem:[%s149_s28 + $0x40] sm:$0xff] %v229_v8  ;;  %v235_v11 = vld [vmem:[%s724_s27 + $0x118] sm:$0xff]  ;;  %232 = vst [vmem:[%s149_s28 + $0x48] sm:$0xff] %v231_v9  ;;  %v237_v12 = vld [vmem:[%s724_s27 + $0x120] sm:$0xff] }
  0x18   : > { %234 = vst [vmem:[%s149_s28 + $0x50] sm:$0xff] %v233_v10  ;;  %236 = vst [vmem:[%s149_s28 + $0x58] sm:$0xff] %v235_v11  ;;  %v239_v13 = vld [vmem:[%s724_s27 + $0x128] sm:$0xff]  ;;  %v241_v14 = vld [vmem:[%s724_s27 + $0x130] sm:$0xff] }
  0x19   : > { %238 = vst [vmem:[%s149_s28 + $0x60] sm:$0xff] %v237_v12  ;;  %240 = vst [vmem:[%s149_s28 + $0x68] sm:$0xff] %v239_v13  ;;  %v243_v15 = vld [vmem:[%s724_s27 + $0x138] sm:$0xff] }
  0x1a   : > { %242 = vst [vmem:[%s149_s28 + $0x70] sm:$0xff] %v241_v14  ;;  %244 = vst [vmem:[%s149_s28 + $0x78] sm:$0xff] %v243_v15 }
  0x1b PF: > { %p517_p6 = scmp.ge.s32.totalorder %s654_s16, 1  ;;  %p249_p7 = scmp.lt.s32.totalorder %s654_s16, 5 }
  0x1d   : > { %p250_p8 = pnand %p517_p6, %p249_p7 }
  0x1e   : > { %s256_s29 = sand.u32 (!%p250_p8), 1, %s638_s12   ;;  %p519_p9 = scmp.ne.s32.totalorder (!%p250_p8), %s646_s14, 0 }
  0x1f   : > { %253 = sbr.rel (%p250_p8) target bundleno = 328 (0x148), region = 66  ;;  %s518_s30 = sshll.u32 (!%p250_p8), %s256_s29, 7 }
  0x20   : > { %s745_s4 = scalar_lea.vmem (!%p250_p8), [#allocation3], %s518_s30 }
  0x26   : > { %279 = sbr.rel (%p519_p9) target bundleno = 45 (0x2d), region = 74  ;;  %vm280_vm0 = vcmask (!%p519_p9), 25600   ;;  %v656_v16 = vmov (!%p519_p9), 0.0  }
  0x27   : > { %281 = vst.msk [vmem:[#allocation2] sm:$0x3] (!%p519_p9), %vm280_vm0, %v656_v16 }
  0x2d PF: > { %v283_v17 = vld [vmem:[%s745_s4] sm:$0xff]  ;;  %v284_v18 = vld [vmem:[%s745_s4 + $0x8] sm:$0xff]  ;;  %vm299_vm1 = vcmask 31744   ;;  %v285_v19 = vld [vmem:[%s745_s4 + $0x10] sm:$0xff]  ;;  %vm344_vm2 = vcmask 1041409   ;;  %vm348_vm3 = vcmask 25600  }
  0x2e   : > { %v286_v20 = vld [vmem:[%s745_s4 + $0x18] sm:$0xff]  ;;  %v300_v21 = vsel %vm299_vm1, %v283_v17, 0.0  ;;  %v301_v22 = vsel %vm299_vm1, %v284_v18, 0.0  ;;  %v287_v23 = vld [vmem:[%s745_s4 + $0x20] sm:$0xff]  ;;  %v303_v25 = vsel %vm299_vm1, %v285_v19, 0.0  ;;  %v292_v27 = vld [vmem:[%s745_s4 + $0x48] sm:$0xff] }
  0x2f   : > { %v302_v24 = vadd.f32 %v301_v22, %v300_v21  ;;  %v291_v26 = vld [vmem:[%s745_s4 + $0x40] sm:$0xff]  ;;  %v293_v28 = vld [vmem:[%s745_s4 + $0x50] sm:$0xff]  ;;  %v305_v29 = vsel %vm299_vm1, %v286_v20, 0.0  ;;  %v288_v30 = vld [vmem:[%s745_s4 + $0x28] sm:$0xff]  ;;  %v322_v34 = vsel %vm299_vm1, %v292_v27, 0.0  ;;  %v307_v37 = vsel %vm299_vm1, %v287_v23, 0.0 }
  0x30   : > { %v294_v31 = vld [vmem:[%s745_s4 + $0x58] sm:$0xff]  ;;  %v321_v33 = vsel %vm299_vm1, %v291_v26, 0.0  ;;  %v324_v35 = vsel %vm299_vm1, %v293_v28, 0.0  ;;  %v295_v36 = vld [vmem:[%s745_s4 + $0x60] sm:$0xff]  ;;  %v289_v39 = vld [vmem:[%s745_s4 + $0x30] sm:$0xff]  ;;  %v309_v43 = vsel %vm299_vm1, %v288_v30, 0.0 }
  0x31   : > { %v304_v32 = vadd.f32 %v303_v25, %v302_v24  ;;  %v323_v38 = vadd.f32 %v322_v34, %v321_v33  ;;  %v326_v41 = vsel %vm299_vm1, %v294_v31, 0.0  ;;  %v296_v42 = vld [vmem:[%s745_s4 + $0x68] sm:$0xff]  ;;  %v290_v45 = vld [vmem:[%s745_s4 + $0x38] sm:$0xff]  ;;  %v328_v47 = vsel %vm299_vm1, %v295_v36, 0.0  ;;  %v297_v48 = vld [vmem:[%s745_s4 + $0x70] sm:$0xff]  ;;  %p520_p10 = scmp.ne.s32.totalorder %s646_s14, 3 }
  0x32   : > { %v311_v49 = vsel %vm299_vm1, %v289_v39, 0.0  ;;  %v330_v52 = vsel %vm299_vm1, %v296_v42, 0.0  ;;  %v298_v53 = vld [vmem:[%s745_s4 + $0x78] sm:$0xff]  ;;  %v313_v54 = vsel %vm299_vm1, %v290_v45, 0.0  ;;  %v332_v57 = vsel %vm299_vm1, %v297_v48, 0.0 }
  0x33   : > { %v306_v40 = vadd.f32 %v305_v29, %v304_v32  ;;  %v325_v44 = vadd.f32 %v324_v35, %v323_v38  ;;  %v334_v60 = vsel %vm299_vm1, %v298_v53, 0.0  ;;  %v282_v10 = vld [vmem:[#allocation2] sm:$0x3]  ;;  %vm367_vm4 = vcmask (!%p520_p10), 1043456  }
  0x34   : > { %v356_v14 = vld [vmem:[%s832_s1] sm:$0xf] (!%p520_p10)  ;;  %v657_v15 = vmov (!%p520_p10), 0.0   ;;  %vm658_vm5 = vmmov (!%p520_p10), 0   ;;  %vm441_vm6 = vcmask (!%p520_p10), 58368  }
  0x35   : > { %v308_v46 = vadd.f32 %v307_v37, %v306_v40  ;;  %v327_v50 = vadd.f32 %v326_v41, %v325_v44  ;;  %531 = vmatprep.subr.mxu0 (!%p520_p10), %v657_v15  ;;  %533 = vmatprep.mubr.msk.f32.mxu0 (!%p520_p10), %vm658_vm5, %v657_v15  ;;  %v521_v18 = vld [vmem:[%s833_s2] ss:$0 sm:$0xff] (!%p520_p10) }
  0x36   : > { %532 = vmatpush3.msk.msra.mxu0 (!%p520_p10), %vm367_vm4, %v356_v14 }
  0x37   : > { %v310_v51 = vadd.f32 %v309_v43, %v308_v46  ;;  %v329_v55 = vadd.f32 %v328_v47, %v327_v50 }
  0x39   : > { %v312_v56 = vadd.f32 %v311_v49, %v310_v51  ;;  %v331_v58 = vadd.f32 %v330_v52, %v329_v55 }
  0x3b   : > { %v314_v59 = vadd.f32 %v313_v54, %v312_v56  ;;  %v333_v61 = vadd.f32 %v332_v57, %v331_v58 }
  0x3d   : > { %v315_v62 = vrot.slane %v314_v59, 4  ;;  %v335_v63 = vadd.f32 %v334_v60, %v333_v61 }
  0x3f   : > { %v316_v0 = vadd.f32 %v315_v62, %v314_v59  ;;  %v336_v1 = vrot.slane %v335_v63, 4 }
  0x41   : > { %v317_v2 = vrot.slane %v316_v0, 2  ;;  %v337_v3 = vadd.f32 %v336_v1, %v335_v63 }
  0x43   : > { %v318_v4 = vadd.f32 %v317_v2, %v316_v0  ;;  %v338_v5 = vrot.slane %v337_v3, 2 }
  0x45   : > { %v319_v6 = vrot.slane %v318_v4, 1  ;;  %v339_v7 = vadd.f32 %v338_v5, %v337_v3 }
  0x47   : > { %v320_v8 = vadd.f32 %v319_v6, %v318_v4  ;;  %v340_v9 = vrot.slane %v339_v7, 1 }
  0x48   : > { %353 = sbr.rel (%p520_p10) target bundleno = 303 (0x12f), region = 78 }
  0x49   : > { %v341_v11 = vadd.f32 %v340_v9, %v339_v7 }
  0x4b   : > { %v345_v12 = vsel %vm344_vm2, %v341_v11, %v320_v8 }
  0x4c   : > { %v347_v13 = vadd.f32 %v345_v12, %v282_v10 }
  0x4e   : > { %349 = vst.msk [vmem:[#allocation2] sm:$0x3] %vm348_vm3, %v347_v13 }
  0x55   : > { %v354_v16 = vld [vmem:[#allocation2] sm:$0x3] }
  0x56   : > { %v355_v17 = vmul.f32 0.00390625, %v354_v16 }
  0x58   : > { %534 = vmatmul.mubr.msk.f32.vlgmr.msra.gmra.mrb[0].mxu0 %vm299_vm1, %v355_v17 }
 0x12b   : > { %v437_v19 = vpop.f32.mrb[0].mxu0 }
 0x12c   : > { %v438_v20 = vadd.f32 %v521_v18, %v437_v19  ;;  %v535_v21 = vpop.f32.mrb[1].mxu0 }
 0x12e   : > { %442 = vst.msk [vmem:[#allocation4] sm:$0x3] %vm441_vm6, %v438_v20 }
 0x12f PF: > { %p790_p11 = scmp.eq.s32.totalorder %s511_s17, 3  ;;  %s659_s10 = smov [#allocation4]  }
 0x130   : > { %s452_s11 = sshll.u32 %s659_s10, 4  ;;  %s453_s11 = int_to_ptr.vmem [resolvable:$true] %s452_s11 }
 0x131   : > { %s586_s12 = scalar_lea.vmem %s453_s11, 32  ;;  %p593_p1 = scmp.lt.s32.totalorder %s453_s11, %s453_s11 }
 0x132   : > { %p587_p12 = scmp.ne.s32.totalorder %s453_s11, %s586_s12  ;;  %p594_p2 = scmp.lt.s32.totalorder %s586_s12, %s586_s12 }
 0x134   : > { %p588_p13 = pnand %p587_p12, %p790_p11  ;;  %p595_p3 = por %p594_p2, %p593_p1 }
 0x136   : > { %p589_p0 = pneg %p588_p13 }
 0x138   : > { %p596_p4 = pnand %p595_p3, %p589_p0 }
 0x13a   : > { %599 = shalt.err (!%p596_p4)
}
 0x13b   : > { %s600_s17 = scalar_lea.hbm %s834_s3, 32 }
 0x13c   : > { %p601_p5 = scmp.ne.s32.totalorder %s834_s3, %s600_s17  ;;  %p606_p8 = scmp.lt.u32.totalorder %s600_s17, %s834_s3 }
 0x13e   : > { %p602_p6 = pnand %p601_p5, %p790_p11 }
 0x140   : > { %p603_p7 = pneg %p602_p6 }
 0x142   : > { %p608_p9 = pnand %p606_p8, %p603_p7 }
 0x144   : > { %611 = shalt.err (!%p608_p9)
}
 0x145   : > { %537 = dma.vmem_to_hbm [thread:$0]  (%p790_p11), %s453_s11, 32, %s834_s3, [#allocation5]  }
 0x146   : > { %633 = dma.done.wait (%p790_p11), [#allocation5], 32  }
 0x147   : > { %635 = vsyncadd (%p790_p11), [#allocation5], 4294967264 }
 0x148 PF: > { %s14_s16 = sadd.s32 1, %s654_s16   ;;  %s836_s12 = smov %s642_s13 }
 0x149   : > { %p11_p10 = scmp.ge.s32.totalorder %s14_s16, 6   ;;  %s837_s13 = smov %s716_s21 }
 0x14a   : > { %s838_s14 = smov %s650_s15  ;;  %s839_s15 = smov %s841_s18 }
 0x14b   :  { %13 = sbr.rel (!%p11_p10) target bundleno = 3 (0x3), region = 111 }
 0x152   :  { %465 = vsyncpa [#allocation5], 1 }
 0x153   :  { %467 = vsyncpa [#allocation5 + $0x1], 1 }

</bundles_post_ra>
